<compile_context>
chip_gen: v5e
topology: v5e:2x2
jax: 0.10.0
libtpu: 0.0.40
codegen_flags: <defaults>
</compile_context>

<pallas_src>
import jax
import jax.numpy as jnp
from jax import lax
from jax.experimental import pallas as pl
from jax.experimental.pallas import tpu as pltpu

_LANES = 128
_MAX_TILE_ROWS = 2048  # (2048,128) f32/int32 block = 1 MiB per input per buffer


def _round_down8(x):
    return (x // 8) * 8


def _make_kernel(rows_valid, tiles_per_split, tile_rows, needs_row_mask):
    """Build the kernel closure (all tiling constants are static at trace time)."""

    def kernel(label_ref, logits_ref, lmask_ref, umask_ref, sum_ref, cnt_ref):
        i = pl.program_id(0)  # split axis ("parallel")
        j = pl.program_id(1)  # row-tile axis ("arbitrary" / reduction)

        @pl.when(j == 0)
        def _():
            sum_ref[...] = jnp.zeros_like(sum_ref)
            cnt_ref[...] = jnp.zeros_like(cnt_ref)

        # Fused preprocessing: casts + mask combine happen here, not in XLA.
        y = label_ref[...].astype(jnp.float32)
        p = logits_ref[...].astype(jnp.float32)
        valid = (lmask_ref[...] == 1) & (umask_ref[...] == 1)

        if needs_row_mask:
            # Rows >= rows_valid in a partial last block hold undefined VMEM
            # contents -> kill them with an iota bound (no host-side padding).
            row0 = (i * tiles_per_split + j) * tile_rows
            local = lax.broadcasted_iota(jnp.int32, (tile_rows, _LANES), 0)
            valid = valid & (local < (rows_valid - row0))

        # BCELoss: -(y*log(p) + (1-y)*log(1-p)), logs clamped at -100 (PyTorch).
        # safe_p sanitizes masked / undefined positions before the log; the final
        # where-gate (not a multiply) keeps any garbage (NaN/Inf) from propagating.
        safe_p = jnp.where(valid, p, jnp.float32(0.5))
        log_p = jnp.maximum(jnp.log(safe_p), jnp.float32(-100.0))
        log_1mp = jnp.maximum(jnp.log(1.0 - safe_p), jnp.float32(-100.0))
        term = log_1mp + y * (log_p - log_1mp)  # == y*log_p + (1-y)*log_1mp
        term = jnp.where(valid, term, jnp.float32(0.0))

        # Sublane-reduce each tile to a (1, 128) lane vector and accumulate
        # straight into the resident output block (no full-tile scratch).
        sum_ref[0] = sum_ref[0] + jnp.sum(term, axis=0, keepdims=True)
        cnt_ref[0] = cnt_ref[0] + jnp.sum(valid.astype(jnp.float32), axis=0,
                                          keepdims=True)

    return kernel


@jax.jit
def masked_bce_loss2(label, logits, label_mask, utt_mask):
    """Equivalent of MaskedBCELoss2.forward (the `device` arg is dropped)."""
    n = label.size
    assert (logits.size == n and label_mask.size == n and utt_mask.size == n), (
        "label, logits, label_mask and utt_mask must have the same number of elements")

    # Metadata-only flattening; dtype casts & mask combine are fused in-kernel.
    lab = jnp.ravel(label)
    prb = jnp.ravel(logits)
    lmk = jnp.ravel(label_mask)
    umk = jnp.ravel(utt_mask)

    rows = pl.cdiv(n, _LANES)
    n2d = rows * _LANES
    if n2d != n:
        # TODO(synk): a 1-D / element-offset block layout would avoid this (single,
        # <128-element) pad copy; the zero-padded masks keep the tail inert.
        pad = n2d - n
        lab = jnp.pad(lab, (0, pad))
        prb = jnp.pad(prb, (0, pad))
        lmk = jnp.pad(lmk, (0, pad))
        umk = jnp.pad(umk, (0, pad))
    lab2d = lab.reshape(rows, _LANES)
    prb2d = prb.reshape(rows, _LANES)
    lmk2d = lmk.reshape(rows, _LANES)
    umk2d = umk.reshape(rows, _LANES)

    # Adaptive tiling: tiny inputs -> one block equal to the whole array; large
    # inputs -> 2048-row blocks, with a 2-way "parallel" split (per-split output
    # slots) when the tile count is even so multi-TC parts stream half each.
    if rows < 8:
        tile_rows = rows                       # block == full array dims (allowed)
    else:
        tile_rows = min(_MAX_TILE_ROWS, _round_down8(rows))
    total_tiles = pl.cdiv(rows, tile_rows)
    n_splits = 2 if (total_tiles >= 2 and total_tiles % 2 == 0) else 1
    tiles_per_split = total_tiles // n_splits
    needs_row_mask = total_tiles * tile_rows > rows

    def in_map(i, j):
        return (i * tiles_per_split + j, 0)

    in_spec = pl.BlockSpec((tile_rows, _LANES), in_map)
    out_spec = pl.BlockSpec((1, 1, _LANES), lambda i, j: (i, 0, 0))

    sum_out, cnt_out = pl.pallas_call(
        _make_kernel(rows, tiles_per_split, tile_rows, needs_row_mask),
        out_shape=(jax.ShapeDtypeStruct((n_splits, 1, _LANES), jnp.float32),
                   jax.ShapeDtypeStruct((n_splits, 1, _LANES), jnp.float32)),
        grid_spec=pltpu.PrefetchScalarGridSpec(
            num_scalar_prefetch=0,
            grid=(n_splits, tiles_per_split),
            in_specs=[in_spec, in_spec, in_spec, in_spec],
            out_specs=[out_spec, out_spec]),
        compiler_params=pltpu.CompilerParams(
            dimension_semantics=("parallel", "arbitrary"),
            vmem_limit_bytes=32 * 1024 * 1024),
    )(lab2d, prb2d, lmk2d, umk2d)

    total = jnp.sum(sum_out)
    count = jnp.sum(cnt_out)
    # Minus sign folded out of the kernel; count == 0 yields NaN, matching
    # PyTorch's mean over an empty selection.
    return -(total / count)


def _reference(label, logits, label_mask, utt_mask):
    m = (jnp.ravel(label_mask) == 1) & (jnp.ravel(utt_mask) == 1)
    y = jnp.ravel(label).astype(jnp.float32)
    p = jnp.ravel(logits).astype(jnp.float32)
    log_p = jnp.maximum(jnp.log(jnp.where(m, p, 0.5)), -100.0)
    log_1mp = jnp.maximum(jnp.log(jnp.where(m, 1.0 - p, 0.5)), -100.0)
    per = -(y * log_p + (1.0 - y) * log_1mp) * m.astype(jnp.float32)
    return jnp.sum(per) / jnp.sum(m.astype(jnp.float32))


if __name__ == "__main__":
    key = jax.random.PRNGKey(0)
    k1, k2, k3 = jax.random.split(key, 3)

    B, S = 2, 8  # batch of dialogues, utterances per dialogue
    # logits: sigmoid outputs in (0, 1), shape (B, S, 1) as typical for BCE heads
    logits = jax.nn.sigmoid(jax.random.normal(k1, (B, S, 1), dtype=jnp.float32))
    # hard binary labels, shape (B, S)
    label = (jax.random.uniform(k2, (B, S)) > 0.5).astype(jnp.float32)
    # mask out padded utterances (same positions for label_mask / utt_mask,
    # broadcast to the logits shape for utt_mask as PyTorch usage implies)
    base_mask = (jax.random.uniform(k3, (B, S)) > 0.25).astype(jnp.int32)
    base_mask = base_mask.at[0, 0].set(1)        # guarantee a non-empty selection
    label_mask = base_mask                       # (B, S)
    utt_mask = base_mask[..., None]              # (B, S, 1)

    loss = masked_bce_loss2(label, logits, label_mask, utt_mask)
    jax.block_until_ready(loss)

    ref = _reference(label, logits, label_mask, utt_mask)
    assert jnp.allclose(loss, ref, rtol=1e-5, atol=1e-5), (loss, ref)

    print("KERNEL_OK")
</pallas_src>

<mosaic_0001>
module attributes {stable_mosaic.version = 11 : i64} {
  func.func @kernel(%arg0: i32, %arg1: i32, %arg2: memref<1x128xf32, #tpu.memory_space<vmem>>, %arg3: memref<1x128xf32, #tpu.memory_space<vmem>>, %arg4: memref<1x128xi32, #tpu.memory_space<vmem>>, %arg5: memref<1x128xi32, #tpu.memory_space<vmem>>, %arg6: memref<1x1x128xf32, #tpu.memory_space<vmem>>, %arg7: memref<1x1x128xf32, #tpu.memory_space<vmem>>) attributes {dimension_semantics = [#tpu.dimension_semantics<parallel>, #tpu.dimension_semantics<arbitrary>], iteration_bounds = array<i64: 1, 1>, scalar_prefetch = 0 : i64, scratch_operands = 0 : i64, tpu.core_type = #tpu.core_type<tc>, window_params = [{transform_indices = @transform_0, window_bounds = array<i64: 1, 128>}, {transform_indices = @transform_1, window_bounds = array<i64: 1, 128>}, {transform_indices = @transform_2, window_bounds = array<i64: 1, 128>}, {transform_indices = @transform_3, window_bounds = array<i64: 1, 128>}, {transform_indices = @transform_4, window_bounds = array<i64: 1, 1, 128>}, {transform_indices = @transform_5, window_bounds = array<i64: 1, 1, 128>}]} {
    %c0_i32 = arith.constant 0 : i32
    %0 = arith.cmpi eq, %arg1, %c0_i32 : i32
    %1 = arith.extui %0 : i1 to i32
    %c0_i32_0 = arith.constant 0 : i32
    %2 = arith.cmpi ne, %1, %c0_i32_0 : i32
    scf.if %2 {
      %cst_27 = arith.constant 0.000000e+00 : f32
      %45 = vector.broadcast %cst_27 : f32 to vector<1x1x128xf32>
      %c0_28 = arith.constant 0 : index
      %c0_29 = arith.constant 0 : index
      %c0_30 = arith.constant 0 : index
      %46 = vector.load %arg6[%c0_28, %c0_29, %c0_30] : memref<1x1x128xf32, #tpu.memory_space<vmem>>, vector<1x1x128xf32>
      tpu.vector_store %arg6[%c0_28, %c0_29, %c0_30], %45 {strides = array<i32>} : memref<1x1x128xf32, #tpu.memory_space<vmem>>, vector<1x1x128xf32>,
      %cst_31 = arith.constant 0.000000e+00 : f32
      %47 = vector.broadcast %cst_31 : f32 to vector<1x1x128xf32>
      %c0_32 = arith.constant 0 : index
      %c0_33 = arith.constant 0 : index
      %c0_34 = arith.constant 0 : index
      %48 = vector.load %arg7[%c0_32, %c0_33, %c0_34] : memref<1x1x128xf32, #tpu.memory_space<vmem>>, vector<1x1x128xf32>
      tpu.vector_store %arg7[%c0_32, %c0_33, %c0_34], %47 {strides = array<i32>} : memref<1x1x128xf32, #tpu.memory_space<vmem>>, vector<1x1x128xf32>,
    } else {
    }
    %c0 = arith.constant 0 : index
    %c0_1 = arith.constant 0 : index
    %3 = vector.load %arg2[%c0, %c0_1] : memref<1x128xf32, #tpu.memory_space<vmem>>, vector<1x128xf32>
    %c0_2 = arith.constant 0 : index
    %c0_3 = arith.constant 0 : index
    %4 = vector.load %arg3[%c0_2, %c0_3] : memref<1x128xf32, #tpu.memory_space<vmem>>, vector<1x128xf32>
    %c0_4 = arith.constant 0 : index
    %c0_5 = arith.constant 0 : index
    %5 = vector.load %arg4[%c0_4, %c0_5] : memref<1x128xi32, #tpu.memory_space<vmem>>, vector<1x128xi32>
    %c1_i32 = arith.constant 1 : i32
    %6 = vector.broadcast %c1_i32 : i32 to vector<1x128xi32>
    %7 = arith.cmpi eq, %5, %6 : vector<1x128xi32>
    %c0_6 = arith.constant 0 : index
    %c0_7 = arith.constant 0 : index
    %8 = vector.load %arg5[%c0_6, %c0_7] : memref<1x128xi32, #tpu.memory_space<vmem>>, vector<1x128xi32>
    %c1_i32_8 = arith.constant 1 : i32
    %9 = vector.broadcast %c1_i32_8 : i32 to vector<1x128xi32>
    %10 = arith.cmpi eq, %8, %9 : vector<1x128xi32>
    %11 = arith.andi %7, %10 : vector<1x128xi1>
    %cst = arith.constant 5.000000e-01 : f32
    %12 = vector.broadcast %cst : f32 to vector<1x128xf32>
    %13 = arith.select %11, %4, %12 : vector<1x128xi1>, vector<1x128xf32>
    %14 = math.log %13 : vector<1x128xf32>
    %cst_9 = arith.constant -1.000000e+02 : f32
    %15 = vector.broadcast %cst_9 : f32 to vector<1x128xf32>
    %16 = arith.maximumf %14, %15 : vector<1x128xf32>
    %cst_10 = arith.constant 1.000000e+00 : f32
    %17 = vector.broadcast %cst_10 : f32 to vector<1x128xf32>
    %18 = arith.subf %17, %13 : vector<1x128xf32>
    %19 = math.log %18 : vector<1x128xf32>
    %cst_11 = arith.constant -1.000000e+02 : f32
    %20 = vector.broadcast %cst_11 : f32 to vector<1x128xf32>
    %21 = arith.maximumf %19, %20 : vector<1x128xf32>
    %22 = arith.subf %16, %21 : vector<1x128xf32>
    %23 = arith.mulf %3, %22 : vector<1x128xf32>
    %24 = arith.addf %21, %23 : vector<1x128xf32>
    %cst_12 = arith.constant 0.000000e+00 : f32
    %25 = vector.broadcast %cst_12 : f32 to vector<1x128xf32>
    %26 = arith.select %11, %24, %25 : vector<1x128xi1>, vector<1x128xf32>
    %c0_13 = arith.constant 0 : index
    %c0_14 = arith.constant 0 : index
    %c0_15 = arith.constant 0 : index
    %27 = vector.load %arg6[%c0_13, %c0_14, %c0_15] : memref<1x1x128xf32, #tpu.memory_space<vmem>>, vector<1x1x128xf32>
    %28 = vector.shape_cast %27 : vector<1x1x128xf32> to vector<1x128xf32>
    %cst_16 = arith.constant dense<0.000000e+00> : vector<128xf32>
    %29 = vector.multi_reduction <add>, %26, %cst_16 [0] : vector<1x128xf32> to vector<128xf32>
    %30 = vector.shape_cast %29 : vector<128xf32> to vector<1x128xf32>
    %31 = arith.addf %28, %30 : vector<1x128xf32>
    %c0_17 = arith.constant 0 : index
    %c0_18 = arith.constant 0 : index
    %c0_19 = arith.constant 0 : index
    %32 = vector.load %arg6[%c0_17, %c0_18, %c0_19] : memref<1x1x128xf32, #tpu.memory_space<vmem>>, vector<1x1x128xf32>
    %33 = vector.shape_cast %32 : vector<1x1x128xf32> to vector<1x128xf32>
    %34 = vector.shape_cast %31 : vector<1x128xf32> to vector<1x1x128xf32>
    tpu.vector_store %arg6[%c0_17, %c0_18, %c0_19], %34 {strides = array<i32>} : memref<1x1x128xf32, #tpu.memory_space<vmem>>, vector<1x1x128xf32>,
    %c0_20 = arith.constant 0 : index
    %c0_21 = arith.constant 0 : index
    %c0_22 = arith.constant 0 : index
    %35 = vector.load %arg7[%c0_20, %c0_21, %c0_22] : memref<1x1x128xf32, #tpu.memory_space<vmem>>, vector<1x1x128xf32>
    %36 = vector.shape_cast %35 : vector<1x1x128xf32> to vector<1x128xf32>
    %37 = arith.extui %11 : vector<1x128xi1> to vector<1x128xi32>
    %38 = arith.sitofp %37 : vector<1x128xi32> to vector<1x128xf32>
    %cst_23 = arith.constant dense<0.000000e+00> : vector<128xf32>
    %39 = vector.multi_reduction <add>, %38, %cst_23 [0] : vector<1x128xf32> to vector<128xf32>
    %40 = vector.shape_cast %39 : vector<128xf32> to vector<1x128xf32>
    %41 = arith.addf %36, %40 : vector<1x128xf32>
    %c0_24 = arith.constant 0 : index
    %c0_25 = arith.constant 0 : index
    %c0_26 = arith.constant 0 : index
    %42 = vector.load %arg7[%c0_24, %c0_25, %c0_26] : memref<1x1x128xf32, #tpu.memory_space<vmem>>, vector<1x1x128xf32>
    %43 = vector.shape_cast %42 : vector<1x1x128xf32> to vector<1x128xf32>
    %44 = vector.shape_cast %41 : vector<1x128xf32> to vector<1x1x128xf32>
    tpu.vector_store %arg7[%c0_24, %c0_25, %c0_26], %44 {strides = array<i32>} : memref<1x1x128xf32, #tpu.memory_space<vmem>>, vector<1x1x128xf32>,
    return
  }
  func.func @transform_0(%arg0: i32, %arg1: i32) -> (i32, i32) {
    %c1_i32 = arith.constant 1 : i32
    %0 = arith.muli %arg0, %c1_i32 : i32
    %1 = arith.addi %0, %arg1 : i32
    %c0_i32 = arith.constant 0 : i32
    %c0_i32_0 = arith.constant 0 : i32
    return %1, %c0_i32 : i32, i32
  }
  func.func @transform_1(%arg0: i32, %arg1: i32) -> (i32, i32) {
    %c1_i32 = arith.constant 1 : i32
    %0 = arith.muli %arg0, %c1_i32 : i32
    %1 = arith.addi %0, %arg1 : i32
    %c0_i32 = arith.constant 0 : i32
    %c0_i32_0 = arith.constant 0 : i32
    return %1, %c0_i32 : i32, i32
  }
  func.func @transform_2(%arg0: i32, %arg1: i32) -> (i32, i32) {
    %c1_i32 = arith.constant 1 : i32
    %0 = arith.muli %arg0, %c1_i32 : i32
    %1 = arith.addi %0, %arg1 : i32
    %c0_i32 = arith.constant 0 : i32
    %c0_i32_0 = arith.constant 0 : i32
    return %1, %c0_i32 : i32, i32
  }
  func.func @transform_3(%arg0: i32, %arg1: i32) -> (i32, i32) {
    %c1_i32 = arith.constant 1 : i32
    %0 = arith.muli %arg0, %c1_i32 : i32
    %1 = arith.addi %0, %arg1 : i32
    %c0_i32 = arith.constant 0 : i32
    %c0_i32_0 = arith.constant 0 : i32
    return %1, %c0_i32 : i32, i32
  }
  func.func @transform_4(%arg0: i32, %arg1: i32) -> (i32, i32, i32) {
    %c0_i32 = arith.constant 0 : i32
    %c0_i32_0 = arith.constant 0 : i32
    %c0_i32_1 = arith.constant 0 : i32
    return %arg0, %c0_i32, %c0_i32_0 : i32, i32, i32
  }
  func.func @transform_5(%arg0: i32, %arg1: i32) -> (i32, i32, i32) {
    %c0_i32 = arith.constant 0 : i32
    %c0_i32_0 = arith.constant 0 : i32
    %c0_i32_1 = arith.constant 0 : i32
    return %arg0, %c0_i32, %c0_i32_0 : i32, i32, i32
  }
}

</mosaic_0001>

<bundles_post_ra>
// kernel: masked_bce_loss2.1
= control target key start
LH: loop header
LB: loop body
LE: loop exit
PB: predicated region body
PF: predicated region fallthrough
CT: control target
= control target key end

     0   :  { %v136_v0 = vmov 0.0   ;;  %s207_s1 = inlined_call_operand.vmem [shape: f32[1,128], index: 1, kind: input, shape index: {}]   ;;  %s208_s2 = inlined_call_operand.vmem [shape: s32[1,128], index: 2, kind: input, shape index: {}]   ;;  %s209_s3 = inlined_call_operand.vmem [shape: s32[1,128], index: 3, kind: input, shape index: {}]   ;;  %s210_s4 = inlined_call_operand.vmem [shape: f32[1,1,128], index: 4, kind: output, shape index: {0}]   ;;  %s211_s5 = inlined_call_operand.vmem [shape: f32[1,1,128], index: 5, kind: output, shape index: {1}]   ;;  %s212_s0 = inlined_call_operand.vmem [shape: f32[1,128], index: 0, kind: input, shape index: {}]  }
   0x1   :  { %79 = vst [vmem:[%s210_s4] sm:$0x1] %v136_v0  ;;  %v83_v1 = vld [vmem:[%s208_s2] sm:$0x1] }
   0x2   :  { %v82_v2 = vld [vmem:[%s207_s1] sm:$0x1]  ;;  %vm84_vm0 = vcmp.eq.s32.totalorder %v83_v1, 1  ;;  %80 = vst [vmem:[%s211_s5] sm:$0x1] %v136_v0 }
   0x3   :  { %v85_v3 = vld [vmem:[%s209_s3] sm:$0x1] }
   0x4   :  { %vm86_vm1 = vcmp.eq.s32.totalorder %v85_v3, 1  ;;  %v81_v16 = vld [vmem:[%s212_s0] sm:$0x1] }
   0x5   :  { %vm182_vm2 = vmand %vm84_vm0, %vm86_vm1 }
   0x6   :  { %v88_v5 = vsel %vm182_vm2, %v82_v2, 0.5  ;;  %v130_v7 = vsel %vm182_vm2, 1.0, %v136_v0 }
   0x7   :  { %132 = vlog2.f32 %v88_v5  ;;  %v92_v6 = vsub.f32 1.0, %v88_v5 }
   0x8   :  { %v100_v20 = vld [vmem:[%s210_s4] sm:$0x1] }
   0x9   :  { %134 = vlog2.f32 %v92_v6  ;;  %v104_v8 = vld [vmem:[%s211_s5] sm:$0x1] }
   0xa   :  { %v108_v9 = vadd.f32 %v130_v7, %v104_v8 }
   0xc   :  { %109 = vst [vmem:[%s211_s5] sm:$0x1] %v108_v9 }
   0xd   :  { %v133_v10 = vpop.eup %132 }
   0xe   :  { %v90_v11 = vmul.f32 0.6931472, %v133_v10 }
   0xf   :  { %v135_v12 = vpop.eup %134 }
  0x10   :  { %v91_v13 = vmax.f32 %v90_v11, -100.0  ;;  %v94_v14 = vmul.f32 0.6931472, %v135_v12 }
  0x12   :  { %v95_v15 = vmax.f32 %v94_v14, -100.0 }
  0x14   :  { %v96_v17 = vsub.f32 %v91_v13, %v95_v15 }
  0x16   :  { %v97_v18 = vmul.f32 %v96_v17, %v81_v16 }
  0x18   :  { %v98_v19 = vadd.f32 %v97_v18, %v95_v15 }
  0x1a   :  { %v99_v21 = vsel %vm182_vm2, %v98_v19, 0.0 }
  0x1b   :  { %v102_v22 = vadd.f32 %v100_v20, %v99_v21 }
  0x1d   :  { %103 = vst [vmem:[%s210_s4] sm:$0x1] %v102_v22 }

</bundles_post_ra>
